<compile_context>
chip_gen: v7x
topology: tpu7x:2x2x1
jax: 0.10.0
libtpu: 0.0.40
codegen_flags: <defaults>
</compile_context>

<pallas_src>
import functools

import jax
import jax.numpy as jnp
from jax.experimental import pallas as pl
from jax.experimental.pallas import tpu as pltpu

LANES = 128
SUBLANES = 8
CHUNK = SUBLANES * LANES          # 1024 elements: keeps rows a multiple of 8


def _mse_partial_kernel(x_ref, t_ref, o_ref, *, rows, first_mask_tile, emit_mask):
    """Accumulate a per-slot (8, 128) f32 partial sum of (x - t)^2."""
    c = pl.program_id(0)                     # slot index ("parallel" axis)
    j = pl.program_id(1)                     # tile index within the slot ("arbitrary")
    g = c * pl.num_programs(1) + j           # global (unclamped) row-tile index

    @pl.when(j == 0)
    def _():
        o_ref[...] = jnp.zeros_like(o_ref)

    tr, ln = x_ref.shape                     # static block shape (tile_rows, 128)
    d = x_ref[...].astype(jnp.float32) - t_ref[...].astype(jnp.float32)
    d2 = d * d

    if emit_mask:
        # Interior tiles: pure cast/sub/mul/add, no mask cost.
        @pl.when(g < first_mask_tile)
        def _():
            o_ref[...] += d2.reshape(tr // SUBLANES, SUBLANES, ln).sum(axis=0)

        # Only the ragged last tile and clamped duplicate tiles pay iota+cmp+select.
        @pl.when(g >= first_mask_tile)
        def _():
            row = g * tr + jax.lax.broadcasted_iota(jnp.int32, (tr, ln), 0)
            md2 = jnp.where(row < rows, d2, 0.0)
            o_ref[...] += md2.reshape(tr // SUBLANES, SUBLANES, ln).sum(axis=0)
    else:
        o_ref[...] += d2.reshape(tr // SUBLANES, SUBLANES, ln).sum(axis=0)


def _device_kind():
    try:
        return jax.devices()[0].device_kind.lower()
    except Exception:
        return ""


def mse_loss(output, target, *, _tile_rows_cap=None):
    """Pallas MSE: mean((output.reshape(target.shape) - target) ** 2)."""
    output = output.reshape(target.shape)    # mirrors output.view(target.size())
    numel = int(target.size)
    if numel == 0:
        return jnp.float32(0.0)

    x = output.reshape(-1)                   # contiguous flatten -- no HBM copy
    t = target.reshape(-1)

    floor = (numel // CHUNK) * CHUNK
    tail_sum = jnp.float32(0.0)
    if floor != numel:
        # < 1024-element tail handled in plain JAX (replaces the old jnp.pad full copy).
        xt = x[floor:].astype(jnp.float32)
        tt = t[floor:].astype(jnp.float32)
        dt = xt - tt
        tail_sum = jnp.sum(dt * dt)

    if floor == 0:
        # Small-input fallback: a kernel launch would dominate at this size.
        return tail_sum / numel

    # TODO(synk): x[:floor] may still materialize a prefix copy in XLA on ragged
    # sizes; a fully copy-free ragged path would need manual DMA from a 1-D HBM ref.
    xm = x[:floor] if floor != numel else x
    tm = t[:floor] if floor != numel else t

    rows = floor // LANES                    # multiple of 8 by construction
    x2 = xm.reshape(rows, LANES)
    t2 = tm.reshape(rows, LANES)

    # Generation-aware block sizing (native-dtype bytes per input block).
    kind = _device_kind()
    is_v7 = "v7" in kind
    itemsize = max(x2.dtype.itemsize, t2.dtype.itemsize)
    block_bytes = (4 << 20) if is_v7 else (2 << 20)   # 16 MiB / 8 MiB double-buffered
    tile_rows_max = max(SUBLANES,
                        (block_bytes // (LANES * itemsize)) // SUBLANES * SUBLANES)
    if _tile_rows_cap is not None:                    # test hook for the masked path
        tile_rows_max = min(tile_rows_max, max(SUBLANES, _tile_rows_cap))
    tile_rows = min(tile_rows_max, rows)
    n_tiles = pl.cdiv(rows, tile_rows)

    # Two partial-sum slots only where there are two TensorCores (v7x) and enough tiles.
    n_slots = 2 if (is_v7 and n_tiles >= 2) else 1
    tiles_per_slot = pl.cdiv(n_tiles, n_slots)
    last_tile = n_tiles - 1

    ragged_last = (rows % tile_rows) != 0
    has_dup = n_slots * tiles_per_slot > n_tiles
    emit_mask = ragged_last or has_dup
    first_mask_tile = last_tile if ragged_last else n_tiles

    def in_map(c, j):
        # Clamp so the block index is always valid; over-range (duplicate) tiles are
        # fully masked inside the kernel using the *unclamped* global index.
        return (jnp.minimum(c * tiles_per_slot + j, last_tile), 0)

    bytes_in = floor * (x2.dtype.itemsize + t2.dtype.itemsize)

    partials = pl.pallas_call(
        functools.partial(_mse_partial_kernel, rows=rows,
                          first_mask_tile=first_mask_tile, emit_mask=emit_mask),
        out_shape=jax.ShapeDtypeStruct((n_slots * SUBLANES, LANES), jnp.float32),
        grid_spec=pltpu.PrefetchScalarGridSpec(
            num_scalar_prefetch=0,
            grid=(n_slots, tiles_per_slot),
            in_specs=[
                pl.BlockSpec((tile_rows, LANES), in_map),
                pl.BlockSpec((tile_rows, LANES), in_map),
            ],
            # Each slot owns its own (8, 128) partial-sum block, resident across the
            # "arbitrary" reduction axis (accumulator pattern).
            out_specs=pl.BlockSpec((SUBLANES, LANES), lambda c, j: (c, 0)),
        ),
        compiler_params=pltpu.CompilerParams(
            dimension_semantics=("parallel", "arbitrary"),
        ),
        cost_estimate=pl.CostEstimate(
            flops=3 * floor,
            transcendentals=0,
            bytes_accessed=bytes_in + n_slots * SUBLANES * LANES * 4,
        ),
    )(x2, t2)

    # Tiny final reduce (<= 2*8*128 f32 values) + tail + mean normalization in JAX.
    return (jnp.sum(partials) + tail_sum) / numel


if __name__ == "__main__":
    key = jax.random.PRNGKey(0)
    k1, k2, k3, k4, k5, k6 = jax.random.split(key, 6)

    # Main check: small NCHW activations, f32 (multiple of 1024 -> unmasked fast path).
    x = jax.random.normal(k1, (2, 4, 16, 16), dtype=jnp.float32)
    target = jax.random.normal(k2, (2, 4, 16, 16), dtype=jnp.float32)
    loss = mse_loss(x, target)
    jax.block_until_ready(loss)
    ref = jnp.mean((x.reshape(target.shape) - target) ** 2)
    assert jnp.allclose(loss, ref, rtol=1e-5, atol=1e-6), (loss, ref)

    # Ragged size > 1 chunk, bf16: kernel on the 1024-multiple prefix + JAX tail sum.
    xb = jax.random.normal(k3, (3, 700), dtype=jnp.bfloat16)
    tb = jax.random.normal(k4, (3, 700), dtype=jnp.bfloat16)
    loss_b = mse_loss(xb, tb)
    jax.block_until_ready(loss_b)
    ref_b = jnp.mean((xb.astype(jnp.float32) - tb.astype(jnp.float32)) ** 2)
    assert jnp.allclose(loss_b, ref_b, rtol=1e-5, atol=1e-6), (loss_b, ref_b)

    # Multi-tile path with a ragged last tile (exercises the predicated row mask).
    xc = jax.random.normal(k5, (3, 8, 128), dtype=jnp.float32)   # 3072 elems -> 24 rows
    tc = jax.random.normal(k6, (3, 8, 128), dtype=jnp.float32)
    loss_c = mse_loss(xc, tc, _tile_rows_cap=16)                 # tiles of 16 rows -> 16 + 8
    jax.block_until_ready(loss_c)
    ref_c = jnp.mean((xc - tc) ** 2)
    assert jnp.allclose(loss_c, ref_c, rtol=1e-5, atol=1e-6), (loss_c, ref_c)

    # Tiny input (< 1024 elements): plain-JAX fallback path.
    xd = jax.random.normal(k3, (3, 5, 7), dtype=jnp.bfloat16)
    td = jax.random.normal(k4, (3, 5, 7), dtype=jnp.bfloat16)
    loss_d = mse_loss(xd, td)
    jax.block_until_ready(loss_d)
    ref_d = jnp.mean((xd.astype(jnp.float32) - td.astype(jnp.float32)) ** 2)
    assert jnp.allclose(loss_d, ref_d, rtol=1e-5, atol=1e-6), (loss_d, ref_d)

    print("KERNEL_OK")
</pallas_src>

<mosaic_0001>
module attributes {stable_mosaic.version = 11 : i64} {
  func.func @_mse_partial_kernel(%arg0: i32, %arg1: i32, %arg2: memref<16x128xf32, #tpu.memory_space<vmem>>, %arg3: memref<16x128xf32, #tpu.memory_space<vmem>>, %arg4: memref<8x128xf32, #tpu.memory_space<vmem>>) attributes {dimension_semantics = [#tpu.dimension_semantics<parallel>, #tpu.dimension_semantics<arbitrary>], iteration_bounds = array<i64: 1, 1>, scalar_prefetch = 0 : i64, scratch_operands = 0 : i64, tpu.core_type = #tpu.core_type<tc>, window_params = [{transform_indices = @transform_0, window_bounds = array<i64: 16, 128>}, {transform_indices = @transform_1, window_bounds = array<i64: 16, 128>}, {transform_indices = @transform_2, window_bounds = array<i64: 8, 128>}]} {
    %c0_i32 = arith.constant 0 : i32
    %0 = arith.cmpi eq, %arg1, %c0_i32 : i32
    %1 = arith.extui %0 : i1 to i32
    %c0_i32_0 = arith.constant 0 : i32
    %2 = arith.cmpi ne, %1, %c0_i32_0 : i32
    scf.if %2 {
      %cst_8 = arith.constant 0.000000e+00 : f32
      %12 = vector.broadcast %cst_8 : f32 to vector<8x128xf32>
      %c0_9 = arith.constant 0 : index
      %c0_10 = arith.constant 0 : index
      %13 = vector.load %arg4[%c0_9, %c0_10] : memref<8x128xf32, #tpu.memory_space<vmem>>, vector<8x128xf32>
      tpu.vector_store %arg4[%c0_9, %c0_10], %12 {strides = array<i32>} : memref<8x128xf32, #tpu.memory_space<vmem>>, vector<8x128xf32>,
    } else {
    }
    %c0 = arith.constant 0 : index
    %c0_1 = arith.constant 0 : index
    %3 = vector.load %arg2[%c0, %c0_1] : memref<16x128xf32, #tpu.memory_space<vmem>>, vector<16x128xf32>
    %c0_2 = arith.constant 0 : index
    %c0_3 = arith.constant 0 : index
    %4 = vector.load %arg3[%c0_2, %c0_3] : memref<16x128xf32, #tpu.memory_space<vmem>>, vector<16x128xf32>
    %5 = arith.subf %3, %4 : vector<16x128xf32>
    %6 = arith.mulf %5, %5 : vector<16x128xf32>
    %c0_4 = arith.constant 0 : index
    %c0_5 = arith.constant 0 : index
    %7 = vector.load %arg4[%c0_4, %c0_5] : memref<8x128xf32, #tpu.memory_space<vmem>>, vector<8x128xf32>
    %8 = vector.shape_cast %6 : vector<16x128xf32> to vector<2x8x128xf32>
    %cst = arith.constant dense<0.000000e+00> : vector<8x128xf32>
    %9 = vector.multi_reduction <add>, %8, %cst [0] : vector<2x8x128xf32> to vector<8x128xf32>
    %10 = arith.addf %7, %9 : vector<8x128xf32>
    %c0_6 = arith.constant 0 : index
    %c0_7 = arith.constant 0 : index
    %11 = vector.load %arg4[%c0_6, %c0_7] : memref<8x128xf32, #tpu.memory_space<vmem>>, vector<8x128xf32>
    tpu.vector_store %arg4[%c0_6, %c0_7], %10 {strides = array<i32>} : memref<8x128xf32, #tpu.memory_space<vmem>>, vector<8x128xf32>,
    return
  }
  func.func @transform_0(%arg0: i32, %arg1: i32) -> (i32, i32) {
    %c1_i32 = arith.constant 1 : i32
    %0 = arith.muli %arg0, %c1_i32 : i32
    %1 = arith.addi %0, %arg1 : i32
    %c0_i32 = arith.constant 0 : i32
    %2 = arith.minsi %1, %c0_i32 : i32
    %c0_i32_0 = arith.constant 0 : i32
    %c0_i32_1 = arith.constant 0 : i32
    return %2, %c0_i32_0 : i32, i32
  }
  func.func @transform_1(%arg0: i32, %arg1: i32) -> (i32, i32) {
    %c1_i32 = arith.constant 1 : i32
    %0 = arith.muli %arg0, %c1_i32 : i32
    %1 = arith.addi %0, %arg1 : i32
    %c0_i32 = arith.constant 0 : i32
    %2 = arith.minsi %1, %c0_i32 : i32
    %c0_i32_0 = arith.constant 0 : i32
    %c0_i32_1 = arith.constant 0 : i32
    return %2, %c0_i32_0 : i32, i32
  }
  func.func @transform_2(%arg0: i32, %arg1: i32) -> (i32, i32) {
    %c0_i32 = arith.constant 0 : i32
    %c0_i32_0 = arith.constant 0 : i32
    return %arg0, %c0_i32 : i32, i32
  }
}

</mosaic_0001>

<bundles_post_ra>
// kernel: tpu_custom_call.1
= control target key start
LH: loop header
LB: loop body
LE: loop exit
PB: predicated region body
PF: predicated region fallthrough
CT: control target
= control target key end

     0   :  { %7 = vsyncpa [#allocation3], 0  ;;  %s231_s0 = inlined_call_operand.hbm [shape: f32[16,128], index: 0, kind: input, shape index: {}]   ;;  %s232_s1 = inlined_call_operand.hbm [shape: f32[16,128], index: 1, kind: input, shape index: {}]   ;;  %s233_s2 = inlined_call_operand.hbm [shape: f32[8,128], index: 2, kind: output, shape index: {}]  }
   0x1   :  { %8 = vsyncpa [#allocation6], 0 }
   0x2   :  { %9 = vsyncpa [#allocation4], 0  ;;  %s175_s9 = smov [#allocation2]   ;;  %s103_s13 = scalar_lea.hbm %s231_s0, 256 }
   0x3   :  { %s21_s10 = sshll.u32 %s175_s9, 4  ;;  %p104_p0 = scmp.ne.s32.totalorder %s231_s0, %s103_s13  ;;  %s22_s10 = int_to_ptr.vmem [resolvable:$true] %s21_s10 }
   0x4   :  { %p107_p1 = scmp.lt.u32.totalorder %s103_s13, %s231_s0 }
   0x6   :  { %p109_p2 = pnand %p107_p1, %p104_p0 }
   0x8   :  { %112 = shalt.err (!%p109_p2)
}
   0x9   :  { %s113_s18 = scalar_lea.vmem %s22_s10, 256  ;;  %p118_p4 = scmp.lt.s32.totalorder %s22_s10, %s22_s10 }
   0xa   :  { %p114_p3 = scmp.ne.s32.totalorder %s22_s10, %s113_s18  ;;  %p119_p5 = scmp.lt.s32.totalorder %s113_s18, %s113_s18 }
   0xc   :  { %p120_p6 = por %p119_p5, %p118_p4 }
   0xe   :  { %p121_p7 = pnand %p120_p6, %p114_p3 }
  0x10   :  { %124 = shalt.err (!%p121_p7)
}
  0x11   :  { %s176_s19 = smov 128   ;;  %s177_s20 = smov 8  }
  0x12   :  { %27 = dma.hbm_to_vmem [thread:$0]  %s231_s0, 256, %s22_s10, [#allocation3], %s176_s19, %s176_s19, %s177_s20  }
  0x13   :  { %s178_s23 = smov [#allocation5]   ;;  %s125_s27 = scalar_lea.hbm %s232_s1, 256 }
  0x14   :  { %s39_s24 = sshll.u32 %s178_s23, 4  ;;  %p126_p8 = scmp.ne.s32.totalorder %s232_s1, %s125_s27  ;;  %s40_s24 = int_to_ptr.vmem [resolvable:$true] %s39_s24 }
  0x15   :  { %p129_p9 = scmp.lt.u32.totalorder %s125_s27, %s232_s1 }
  0x17   :  { %p131_p10 = pnand %p129_p9, %p126_p8 }
  0x19   :  { %134 = shalt.err (!%p131_p10)
}
  0x1a   :  { %s135_s4 = scalar_lea.vmem %s40_s24, 256  ;;  %p140_p12 = scmp.lt.s32.totalorder %s40_s24, %s40_s24 }
  0x1b   :  { %p136_p11 = scmp.ne.s32.totalorder %s40_s24, %s135_s4  ;;  %p141_p13 = scmp.lt.s32.totalorder %s135_s4, %s135_s4 }
  0x1d   :  { %p142_p0 = por %p141_p13, %p140_p12 }
  0x1f   :  { %p143_p1 = pnand %p142_p0, %p136_p11 }
  0x21   :  { %146 = shalt.err (!%p143_p1)
}
  0x22   :  { %45 = dma.hbm_to_vmem [thread:$0]  %s232_s1, 256, %s40_s24, [#allocation6], %s176_s19, %s176_s19, %s177_s20  }
  0x23   :  { %169 = dma.done.wait [#allocation3], 256  }
  0x24   :  { %170 = vsyncadd [#allocation3], 4294967040 }
  0x25   :  { %171 = dma.done.wait [#allocation6], 256  }
  0x26   :  { %172 = vsyncadd [#allocation6], 4294967040  ;;  %v65_v0 = vld [vmem:[#allocation2] sm:$0xff]  ;;  %v66_v1 = vld [vmem:[#allocation2 + $0x8] sm:$0xff]  ;;  %s179_s6 = smov [#allocation7]  }
  0x27   :  { %v67_v2 = vld [vmem:[#allocation5] sm:$0xff]  ;;  %v68_v3 = vld [vmem:[#allocation5 + $0x8] sm:$0xff]  ;;  %s83_s7 = sshll.u32 %s179_s6, 4  ;;  %s84_s7 = int_to_ptr.vmem [resolvable:$true] %s83_s7 }
  0x28   :  { %v69_v4 = vsub.f32 %v65_v0, %v67_v2  ;;  %v70_v5 = vsub.f32 %v66_v1, %v68_v3  ;;  %s147_s8 = scalar_lea.vmem %s84_s7, 128  ;;  %p152_p3 = scmp.lt.s32.totalorder %s84_s7, %s84_s7 }
  0x29   :  { %p148_p2 = scmp.ne.s32.totalorder %s84_s7, %s147_s8  ;;  %p153_p4 = scmp.lt.s32.totalorder %s147_s8, %s147_s8 }
  0x2a   :  { %v71_v6 = vmul.f32 %v69_v4, %v69_v4  ;;  %v72_v7 = vmul.f32 %v70_v5, %v70_v5 }
  0x2b   :  { %p154_p5 = por %p153_p4, %p152_p3 }
  0x2c   :  { %v74_v8 = vadd.f32 %v72_v7, %v71_v6 }
  0x2d   :  { %p155_p6 = pnand %p154_p5, %p148_p2 }
  0x2e   :  { %76 = vst [vmem:[#allocation7] sm:$0xff] %v74_v8 }
  0x2f   :  { %158 = shalt.err (!%p155_p6)
}
  0x30   :  { %s159_s10 = scalar_lea.hbm %s233_s2, 128 }
  0x31   :  { %p160_p7 = scmp.ne.s32.totalorder %s233_s2, %s159_s10  ;;  %p163_p8 = scmp.lt.u32.totalorder %s159_s10, %s233_s2 }
  0x33   :  { %p165_p9 = pnand %p163_p8, %p160_p7 }
  0x35   :  { %168 = shalt.err (!%p165_p9)
}
  0x36   :  { %86 = dma.vmem_to_hbm [thread:$0]  %s84_s7, 128, %s233_s2, [#allocation4]  }
  0x37   :  { %173 = dma.done.wait [#allocation4], 128  }
  0x38   :  { %174 = vsyncadd [#allocation4], 4294967168 }
  0x39   :  { %90 = vsyncpa [#allocation3], 1 }
  0x3a   :  { %91 = vsyncpa [#allocation6], 1 }
  0x3b   :  { %92 = vsyncpa [#allocation4], 1 }

</bundles_post_ra>
